<compile_context>
chip_gen: v7x
topology: tpu7x:2x2x1
jax: 0.10.0
libtpu: 0.0.40
codegen_flags: <defaults>
</compile_context>

<pallas_src>
import jax
import jax.numpy as jnp
from jax.experimental import pallas as pl
from jax.experimental.pallas import tpu as pltpu

HIDDEN = 128
LANE = 128


def _round_up(n, m):
    return ((n + m - 1) // m) * m


def _qnetwork_kernel(x_ref, w1_ref, b1_ref, w2_ref, b2_ref, o_ref):
    out_size = o_ref.shape[-1]
    # Layer 1: in-kernel bf16 cast of x, bf16 MXU matmul, f32 accumulation.
    h = jnp.dot(x_ref[...].astype(jnp.bfloat16), w1_ref[...],
                preferred_element_type=jnp.float32)
    h = jnp.maximum(h + b1_ref[...], 0.0)            # b1 is (1, HIDDEN), broadcasts
    # Layer 2: kept in f32 (128 x out_pad, cheap) for Q-value accuracy.
    out = jnp.dot(h, w2_ref[...], preferred_element_type=jnp.float32)
    # Slice away the MXU lane padding BEFORE the store: only out_size columns hit HBM.
    o_ref[...] = (out[:, :out_size] + b2_ref[...]).astype(o_ref.dtype)


def prepare_params(w1, b1, w2, b2):
    """One-time param prep (hoisted out of the forward path).

    w1: [in, HIDDEN], b1: [HIDDEN] or [1, HIDDEN], w2: [HIDDEN, out], b2: [out] or [1, out].
    Returns kernel-ready operands: bf16 w1, f32 b1, f32 w2 padded to a 128-lane multiple,
    f32 b2 (unpadded), and the true out_size.
    """
    out_size = w2.shape[1]
    out_pad = _round_up(max(out_size, 1), LANE)
    w1_bf = w1.astype(jnp.bfloat16)
    b1_f = jnp.asarray(b1, jnp.float32).reshape(1, HIDDEN)
    w2_f = jnp.pad(jnp.asarray(w2, jnp.float32), ((0, 0), (0, out_pad - out_size)))
    b2_f = jnp.asarray(b2, jnp.float32).reshape(1, out_size)
    return w1_bf, b1_f, w2_f, b2_f, out_size


def qnetwork_forward(x, w1_bf, b1_f, w2_pad, b2_f, out_size, *, block_m=1024):
    """x: [B, in] f32. Params must come from prepare_params()."""
    B, in_size = x.shape
    out_pad = w2_pad.shape[1]

    # Batch tile: aim for >= 2 grid tiles (v7x has 2 TCs), multiple of 16, never
    # (much) larger than the batch itself for tiny-batch RL inference.
    bm = min(block_m, _round_up(pl.cdiv(B, 2), 16))
    bm = max(8, min(bm, _round_up(B, 8)))
    grid = (pl.cdiv(B, bm),)

    return pl.pallas_call(
        _qnetwork_kernel,
        out_shape=jax.ShapeDtypeStruct((B, out_size), jnp.float32),
        grid_spec=pltpu.PrefetchScalarGridSpec(
            num_scalar_prefetch=0,
            grid=grid,
            in_specs=[
                # activations: tiled over batch (partial last block is masked by Pallas)
                pl.BlockSpec((bm, in_size), lambda i: (i, 0)),
                # weights / biases: same block every step -> stay resident in VMEM
                pl.BlockSpec((in_size, HIDDEN), lambda i: (0, 0)),
                pl.BlockSpec((1, HIDDEN), lambda i: (0, 0)),
                pl.BlockSpec((HIDDEN, out_pad), lambda i: (0, 0)),
                pl.BlockSpec((1, out_size), lambda i: (0, 0)),
            ],
            out_specs=pl.BlockSpec((bm, out_size), lambda i: (i, 0)),
        ),
        compiler_params=pltpu.CompilerParams(
            # batch tiles are independent -> megacore / 2-TC sharding on v7x
            dimension_semantics=("parallel",),
            # explicit budget keeps larger tiles legal on v5e's 16 MiB default scoped VMEM
            vmem_limit_bytes=32 * 1024 * 1024,
        ),
    )(x, w1_bf, b1_f, w2_pad, b2_f)


def init_params(key, input_size, output_size):
    """Deterministic init mimicking nn.Linear's U(-1/sqrt(fan_in), 1/sqrt(fan_in)),
    stored pre-transposed to [in, out] layout."""
    k1, k2, k3, k4 = jax.random.split(key, 4)
    bound1 = 1.0 / (input_size ** 0.5)
    bound2 = 1.0 / (HIDDEN ** 0.5)
    w1 = jax.random.uniform(k1, (input_size, HIDDEN), jnp.float32, -bound1, bound1)
    b1 = jax.random.uniform(k2, (1, HIDDEN), jnp.float32, -bound1, bound1)
    w2 = jax.random.uniform(k3, (HIDDEN, output_size), jnp.float32, -bound2, bound2)
    b2 = jax.random.uniform(k4, (1, output_size), jnp.float32, -bound2, bound2)
    return w1, b1, w2, b2


def _ref_forward(x, w1, b1, w2, b2):
    return jnp.maximum(x @ w1 + b1, 0.0) @ w2 + b2


if __name__ == "__main__":
    input_size = 32
    output_size = 4

    key = jax.random.PRNGKey(0)
    kx, kp, kx2 = jax.random.split(key, 3)
    w1, b1, w2, b2 = init_params(kp, input_size, output_size)
    # One-time, hoisted param prep (casts + lane padding of w2).
    w1_bf, b1_f, w2_pad, b2_f, osize = prepare_params(w1, b1, w2, b2)

    # Small batch (toy / single-env RL case; exercises the bm clamp, grid=(1,)).
    batch = 8
    x = jax.random.normal(kx, (batch, input_size), jnp.float32)
    y = jax.block_until_ready(qnetwork_forward(x, w1_bf, b1_f, w2_pad, b2_f, osize))
    ref = _ref_forward(x, w1, b1, w2, b2)
    assert y.shape == (batch, output_size)
    # layer 1 runs in bf16 with f32 accumulation -> modest tolerance
    assert jnp.allclose(y, ref, atol=3e-2, rtol=3e-2), "mismatch vs reference (small batch)"

    # Larger, non-aligned batch: exercises the cdiv grid, the partial last block
    # (masked output stores) and multi-tile / 2-TC sharding.
    batch2 = 300
    x2 = jax.random.normal(kx2, (batch2, input_size), jnp.float32)
    y2 = jax.block_until_ready(qnetwork_forward(x2, w1_bf, b1_f, w2_pad, b2_f, osize))
    ref2 = _ref_forward(x2, w1, b1, w2, b2)
    assert y2.shape == (batch2, output_size)
    assert jnp.allclose(y2, ref2, atol=3e-2, rtol=3e-2), "mismatch vs reference (batched grid)"

    print("KERNEL_OK")
</pallas_src>

<mosaic_0001>
module attributes {stable_mosaic.version = 11 : i64} {
  func.func @_qnetwork_kernel(%arg0: i32, %arg1: memref<8x32xf32, #tpu.memory_space<vmem>>, %arg2: memref<32x128xbf16, #tpu.memory_space<vmem>>, %arg3: memref<1x128xf32, #tpu.memory_space<vmem>>, %arg4: memref<128x128xf32, #tpu.memory_space<vmem>>, %arg5: memref<1x4xf32, #tpu.memory_space<vmem>>, %arg6: memref<8x4xf32, #tpu.memory_space<vmem>>) attributes {dimension_semantics = [#tpu.dimension_semantics<parallel>], iteration_bounds = array<i64: 1>, scalar_prefetch = 0 : i64, scratch_operands = 0 : i64, tpu.core_type = #tpu.core_type<tc>, window_params = [{transform_indices = @transform_0, window_bounds = array<i64: 8, 32>}, {pipeline_mode = #tpu.pipeline_mode<synchronous>, transform_indices = @transform_1, window_bounds = array<i64: 32, 128>}, {pipeline_mode = #tpu.pipeline_mode<synchronous>, transform_indices = @transform_2, window_bounds = array<i64: 1, 128>}, {pipeline_mode = #tpu.pipeline_mode<synchronous>, transform_indices = @transform_3, window_bounds = array<i64: 128, 128>}, {pipeline_mode = #tpu.pipeline_mode<synchronous>, transform_indices = @transform_4, window_bounds = array<i64: 1, 4>}, {transform_indices = @transform_5, window_bounds = array<i64: 8, 4>}]} {
    %c0 = arith.constant 0 : index
    %c0_0 = arith.constant 0 : index
    %0 = vector.load %arg1[%c0, %c0_0] : memref<8x32xf32, #tpu.memory_space<vmem>>, vector<8x32xf32>
    %1 = arith.truncf %0 : vector<8x32xf32> to vector<8x32xbf16>
    %c0_1 = arith.constant 0 : index
    %c0_2 = arith.constant 0 : index
    %2 = vector.load %arg2[%c0_1, %c0_2] : memref<32x128xbf16, #tpu.memory_space<vmem>>, vector<32x128xbf16>
    %cst = arith.constant dense<0.000000e+00> : vector<8x128xf32>
    %3 = tpu.matmul %1, %2, %cst {dimension_numbers = #tpu.dot_dimension_numbers<[1], [0], [0], [1], [0, 0, 1, 1], [], []>} : vector<8x32xbf16>, vector<32x128xbf16>, vector<8x128xf32> -> vector<8x128xf32>
    %c0_3 = arith.constant 0 : index
    %c0_4 = arith.constant 0 : index
    %4 = vector.load %arg3[%c0_3, %c0_4] : memref<1x128xf32, #tpu.memory_space<vmem>>, vector<1x128xf32>
    %5 = vector.broadcast %4 : vector<1x128xf32> to vector<8x128xf32>
    %6 = arith.addf %3, %5 : vector<8x128xf32>
    %cst_5 = arith.constant 0.000000e+00 : f32
    %7 = vector.broadcast %cst_5 : f32 to vector<8x128xf32>
    %8 = arith.maximumf %6, %7 : vector<8x128xf32>
    %c0_6 = arith.constant 0 : index
    %c0_7 = arith.constant 0 : index
    %9 = vector.load %arg4[%c0_6, %c0_7] : memref<128x128xf32, #tpu.memory_space<vmem>>, vector<128x128xf32>
    %cst_8 = arith.constant dense<0.000000e+00> : vector<8x128xf32>
    %10 = tpu.matmul %8, %9, %cst_8 {dimension_numbers = #tpu.dot_dimension_numbers<[1], [0], [0], [1], [0, 0, 1, 1], [], []>} : vector<8x128xf32>, vector<128x128xf32>, vector<8x128xf32> -> vector<8x128xf32>
    %11 = vector.extract_strided_slice %10 {offsets = [0, 0], sizes = [8, 4], strides = [1, 1]} : vector<8x128xf32> to vector<8x4xf32>
    %c0_9 = arith.constant 0 : index
    %c0_10 = arith.constant 0 : index
    %12 = vector.load %arg5[%c0_9, %c0_10] : memref<1x4xf32, #tpu.memory_space<vmem>>, vector<1x4xf32>
    %13 = vector.broadcast %12 : vector<1x4xf32> to vector<8x4xf32>
    %14 = arith.addf %11, %13 : vector<8x4xf32>
    %c0_11 = arith.constant 0 : index
    %c0_12 = arith.constant 0 : index
    %15 = vector.load %arg6[%c0_11, %c0_12] : memref<8x4xf32, #tpu.memory_space<vmem>>, vector<8x4xf32>
    tpu.vector_store %arg6[%c0_11, %c0_12], %14 {strides = array<i32>} : memref<8x4xf32, #tpu.memory_space<vmem>>, vector<8x4xf32>,
    return
  }
  func.func @transform_0(%arg0: i32) -> (i32, i32) {
    %c0_i32 = arith.constant 0 : i32
    %c0_i32_0 = arith.constant 0 : i32
    return %arg0, %c0_i32 : i32, i32
  }
  func.func @transform_1(%arg0: i32) -> (i32, i32) {
    %c0_i32 = arith.constant 0 : i32
    %c0_i32_0 = arith.constant 0 : i32
    %c0_i32_1 = arith.constant 0 : i32
    return %c0_i32, %c0_i32_0 : i32, i32
  }
  func.func @transform_2(%arg0: i32) -> (i32, i32) {
    %c0_i32 = arith.constant 0 : i32
    %c0_i32_0 = arith.constant 0 : i32
    %c0_i32_1 = arith.constant 0 : i32
    return %c0_i32, %c0_i32_0 : i32, i32
  }
  func.func @transform_3(%arg0: i32) -> (i32, i32) {
    %c0_i32 = arith.constant 0 : i32
    %c0_i32_0 = arith.constant 0 : i32
    %c0_i32_1 = arith.constant 0 : i32
    return %c0_i32, %c0_i32_0 : i32, i32
  }
  func.func @transform_4(%arg0: i32) -> (i32, i32) {
    %c0_i32 = arith.constant 0 : i32
    %c0_i32_0 = arith.constant 0 : i32
    %c0_i32_1 = arith.constant 0 : i32
    return %c0_i32, %c0_i32_0 : i32, i32
  }
  func.func @transform_5(%arg0: i32) -> (i32, i32) {
    %c0_i32 = arith.constant 0 : i32
    %c0_i32_0 = arith.constant 0 : i32
    return %arg0, %c0_i32 : i32, i32
  }
}

</mosaic_0001>

<bundles_post_ra>
// kernel: tpu_custom_call.1
= control target key start
LH: loop header
LB: loop body
LE: loop exit
PB: predicated region body
PF: predicated region fallthrough
CT: control target
= control target key end

     0   :  { %10 = vsyncpa [#allocation3], 0  ;;  %s491_s0 = inlined_call_operand.hbm [shape: f32[8,32], index: 0, kind: input, shape index: {}]   ;;  %s492_s1 = inlined_call_operand.hbm [shape: bf16[32,128], index: 1, kind: input, shape index: {}]   ;;  %s493_s2 = inlined_call_operand.vmem [shape: f32[1,128], index: 2, kind: input, shape index: {}]   ;;  %s494_s3 = inlined_call_operand.hbm [shape: f32[128,128], index: 3, kind: input, shape index: {}]   ;;  %s495_s4 = inlined_call_operand.vmem [shape: f32[1,4], index: 4, kind: input, shape index: {}]   ;;  %s496_s5 = inlined_call_operand.vmem [shape: f32[8,4], index: 5, kind: output, shape index: {}]  }
   0x1   :  { %11 = vsyncpa [#allocation5], 0  ;;  %s406_s18 = smov [#allocation4]   ;;  %s336_s22 = scalar_lea.hbm %s492_s1, 256 }
   0x2   :  { %s27_s19 = sshll.u32 %s406_s18, 4  ;;  %p337_p0 = scmp.ne.s32.totalorder %s492_s1, %s336_s22  ;;  %s28_s19 = int_to_ptr.vmem [resolvable:$true] %s27_s19 }
   0x3   :  { %p340_p1 = scmp.lt.u32.totalorder %s336_s22, %s492_s1 }
   0x5   :  { %p342_p2 = pnand %p340_p1, %p337_p0 }
   0x7   :  { %345 = shalt.err (!%p342_p2)
}
   0x8   :  { %s346_s27 = scalar_lea.vmem %s28_s19, 256  ;;  %p351_p4 = scmp.lt.s32.totalorder %s28_s19, %s28_s19 }
   0x9   :  { %p347_p3 = scmp.ne.s32.totalorder %s28_s19, %s346_s27  ;;  %p352_p5 = scmp.lt.s32.totalorder %s346_s27, %s346_s27 }
   0xb   :  { %p353_p6 = por %p352_p5, %p351_p4 }
   0xd   :  { %p354_p7 = pnand %p353_p6, %p347_p3 }
   0xf   :  { %357 = shalt.err (!%p354_p7)
}
  0x10   :  { %s407_s28 = smov 64   ;;  %s408_s29 = smov 4  }
  0x11   :  { %33 = dma.hbm_to_vmem [thread:$0]  %s492_s1, 256, %s28_s19, [#allocation5], %s407_s28, %s407_s28, %s408_s29  }
  0x12   :  { %s409_s7 = smov [#allocation2]   ;;  %s410_s9 = smov [#allocation6]  }
  0x13   :  { %s18_s8 = sshll.u32 %s409_s7, 4  ;;  %s41_s10 = sshll.u32 %s410_s9, 4  ;;  %s19_s8 = int_to_ptr.vmem [resolvable:$true] %s18_s8  ;;  %s42_s10 = int_to_ptr.vmem [resolvable:$true] %s41_s10 }
  0x14   :  { %s358_s13 = scalar_lea.hbm %s491_s0, 128 }
  0x15   :  { %p359_p8 = scmp.ne.s32.totalorder %s491_s0, %s358_s13  ;;  %p362_p9 = scmp.lt.u32.totalorder %s358_s13, %s491_s0 }
  0x17   :  { %p364_p10 = pnand %p362_p9, %p359_p8 }
  0x19   :  { %367 = shalt.err (!%p364_p10)
}
  0x1a   :  { %s368_s1 = scalar_lea.vmem %s19_s8, 128  ;;  %p373_p12 = scmp.lt.s32.totalorder %s19_s8, %s19_s8 }
  0x1b   :  { %p369_p11 = scmp.ne.s32.totalorder %s19_s8, %s368_s1  ;;  %p374_p13 = scmp.lt.s32.totalorder %s368_s1, %s368_s1 }
  0x1d   :  { %p375_p0 = por %p374_p13, %p373_p12 }
  0x1f   :  { %p376_p1 = pnand %p375_p0, %p369_p11 }
  0x21   :  { %379 = shalt.err (!%p376_p1)
}
  0x22   :  { %21 = dma.hbm_to_vmem [thread:$0]  %s491_s0, 128, %s19_s8, [#allocation3]  }
  0x23   :  { %s380_s22 = scalar_lea.hbm %s494_s3, 2048 }
  0x24   :  { %p381_p2 = scmp.ne.s32.totalorder %s494_s3, %s380_s22  ;;  %p384_p3 = scmp.lt.u32.totalorder %s380_s22, %s494_s3 }
  0x26   :  { %p386_p4 = pnand %p384_p3, %p381_p2 }
  0x28   :  { %389 = shalt.err (!%p386_p4)
}
  0x29   :  { %s390_s27 = scalar_lea.vmem %s42_s10, 2048  ;;  %p395_p6 = scmp.lt.s32.totalorder %s42_s10, %s42_s10 }
  0x2a   :  { %p391_p5 = scmp.ne.s32.totalorder %s42_s10, %s390_s27  ;;  %p396_p7 = scmp.lt.s32.totalorder %s390_s27, %s390_s27 }
  0x2c   :  { %p397_p8 = por %p396_p7, %p395_p6 }
  0x2e   :  { %p398_p9 = pnand %p397_p8, %p391_p5 }
  0x30   :  { %401 = shalt.err (!%p398_p9)
}
  0x31   :  { %s411_s0 = smov 128   ;;  %s412_s28 = smov 8  }
  0x32   :  { %47 = dma.hbm_to_vmem [thread:$0]  %s494_s3, 2048, %s42_s10, [#allocation5], %s411_s0, %s411_s0, %s412_s28  }
  0x33   :  { %402 = dma.done.wait [#allocation3], 128  }
  0x34   :  { %403 = vsyncadd [#allocation3], 4294967168 }
  0x35   :  { %404 = dma.done.wait [#allocation5], 2304  }
  0x36   :  { %405 = vsyncadd [#allocation5], 4294964992  ;;  %v413_v0 = vmov 0.0   ;;  %vm414_vm0 = vmmov 0   ;;  %v415_v1 = vmov 0.0|0.0   ;;  %v334_v2 = vld [vmem:[#allocation4] sm:$0xff]  }
  0x37   :  { %257 = vmatprep.subr.bf16.mxu0 %v413_v0  ;;  %261 = vmatprep.mubr.msk.bf16.mxu0 %vm414_vm0, %v413_v0  ;;  %v335_v3 = vld [vmem:[#allocation4 + $0x8] sm:$0xff]   ;;  %v60_v4 = vld [vmem:[#allocation2] sm:$0xff]  ;;  %v130_v5 = vld [vmem:[#allocation6] sm:$0xff]  ;;  %vm85_vm1 = vcmask 261120   ;;  %vm224_vm2 = vcmask 31744  }
  0x38   :  { %300 = vmatprep.subr.bf16.mxu1 %v415_v1  ;;  %297 = vmatprep.mubr.msk.f32.mxu1 %vm414_vm0, %v413_v0  ;;  %v131_v6 = vld [vmem:[#allocation6 + $0x8] sm:$0xff]  ;;  %v132_v8 = vld [vmem:[#allocation6 + $0x10] sm:$0xff]  ;;  %v133_v9 = vld [vmem:[#allocation6 + $0x18] sm:$0xff]  ;;  %v61_v10 = vpack.c.bf16 %v60_v4, %v60_v4 }
  0x39   :  { %258 = vmatpush3.bf16.msra.mxu0 %v334_v2  ;;  %v301_v7 = vpack.c.bf16 %v131_v6, %v130_v5  ;;  %v304_v11 = vpack.c.bf16 %v133_v9, %v132_v8  ;;  %v134_v12 = vld [vmem:[#allocation6 + $0x20] sm:$0xff]  ;;  %v135_v13 = vld [vmem:[#allocation6 + $0x28] sm:$0xff]  ;;  %v136_v15 = vld [vmem:[#allocation6 + $0x30] sm:$0xff] }
  0x3a   :  { %259 = vmatprep.subr.bf16.mxu0 %v413_v0  ;;  %v307_v14 = vpack.c.bf16 %v135_v13, %v134_v12  ;;  %v137_v16 = vld [vmem:[#allocation6 + $0x38] sm:$0xff]  ;;  %v138_v18 = vld [vmem:[#allocation6 + $0x40] sm:$0xff]  ;;  %v139_v19 = vld [vmem:[#allocation6 + $0x48] sm:$0xff] }
  0x3b   :  { %302 = vmatpush3.bf16.msra.mxu1 %v301_v7  ;;  %v310_v17 = vpack.c.bf16 %v137_v16, %v136_v15  ;;  %v313_v20 = vpack.c.bf16 %v139_v19, %v138_v18  ;;  %v140_v21 = vld [vmem:[#allocation6 + $0x50] sm:$0xff]  ;;  %v141_v22 = vld [vmem:[#allocation6 + $0x58] sm:$0xff]  ;;  %v142_v24 = vld [vmem:[#allocation6 + $0x60] sm:$0xff] }
  0x3c   :  { %303 = vmatprep.subr.bf16.mxu1 %v415_v1  ;;  %v316_v23 = vpack.c.bf16 %v141_v22, %v140_v21  ;;  %v143_v25 = vld [vmem:[#allocation6 + $0x68] sm:$0xff]  ;;  %v144_v27 = vld [vmem:[#allocation6 + $0x70] sm:$0xff]  ;;  %v145_v28 = vld [vmem:[#allocation6 + $0x78] sm:$0xff] }
  0x3d   :  { %260 = vmatpush3.bf16.msra.mxu0 %v335_v3  ;;  %v319_v26 = vpack.c.bf16 %v143_v25, %v142_v24  ;;  %v322_v29 = vpack.c.bf16 %v145_v28, %v144_v27  ;;  %v232_v30 = vld [vmem:[%s493_s2] ss:$0 sm:$0xff] }
  0x3e   :  { %v236_v37 = vld [vmem:[%s495_s4] ss:$0 sm:$0xff] }
  0x3f   :  { %305 = vmatpush3.bf16.msra.mxu1 %v304_v11 }
  0x40   :  { %262 = vmatmul.mubr.msk.bf16.vlgmr.msra.gmra.mrb[0].mxu0 %vm85_vm1, %v61_v10  ;;  %306 = vmatprep.subr.bf16.mxu1 %v415_v1 }
  0x43   :  { %308 = vmatpush3.bf16.msra.mxu1 %v307_v14 }
  0x44   :  { %309 = vmatprep.subr.bf16.mxu1 %v415_v1 }
  0x47   :  { %311 = vmatpush3.bf16.msra.mxu1 %v310_v17 }
  0x48   :  { %312 = vmatprep.subr.bf16.mxu1 %v415_v1 }
  0x4b   :  { %314 = vmatpush3.bf16.msra.mxu1 %v313_v20 }
  0x4c   :  { %315 = vmatprep.subr.bf16.mxu1 %v415_v1 }
  0x4f   :  { %317 = vmatpush3.bf16.msra.mxu1 %v316_v23 }
  0x50   :  { %318 = vmatprep.subr.bf16.mxu1 %v415_v1 }
  0x53   :  { %320 = vmatpush3.bf16.msra.mxu1 %v319_v26 }
  0x54   :  { %321 = vmatprep.subr.bf16.mxu1 %v415_v1 }
  0x57   :  { %323 = vmatpush3.bf16.msra.mxu1 %v322_v29 }
 0x113   :  { %v123_v31 = vpop.f32.mrb[0].mxu0 }
 0x114   :  { %v124_v32 = vadd.f32 %v232_v30, %v123_v31  ;;  %v263_v33 = vpop.f32.mrb[1].mxu0 }
 0x115   :  { %v126_v34 = vpop.f32.mrb[2].mxu0 }
 0x116   :  { %v129_v35 = vmax.f32 %v124_v32, 0.0  ;;  %v264_v36 = vpop.f32.mrb[3].mxu0 }
 0x118   :  { %298 = vmatmul.mubr.f32.vlgmr.msra.gmra.mrb[0].mxu1 %v129_v35 }
 0x1eb   :  { %v212_v38 = vpop.f32.mrb[0].mxu1 }
 0x1ec   :  { %v223_v39 = vadd.f32 %v236_v37, %v212_v38  ;;  %v299_v40 = vpop.f32.mrb[1].mxu1 }
 0x1ee   :  { %225 = vst.msk [vmem:[%s496_s5] sm:$0xff] %vm224_vm2, %v223_v39 }
 0x1ef   :  { %230 = vsyncpa [#allocation3], 1 }
 0x1f0   :  { %231 = vsyncpa [#allocation5], 1 }

</bundles_post_ra>
